<compile_context>
chip_gen: v5e
topology: v5e:2x2
jax: 0.10.0
libtpu: 0.0.40
codegen_flags: <defaults>
</compile_context>

<pallas_src>
import functools

import jax
import jax.numpy as jnp
from jax.experimental import pallas as pl
from jax.experimental.pallas import tpu as pltpu

HIDDEN = 32


def _critic_kernel(x_ref, w1_ref, w2_ref, w3_ref, w4_ref, b_ref, o_ref):
    """One batch tile: x_ref is (state_dim, TILE_B), o_ref is (action_num, TILE_B)."""
    hidden = w1_ref.shape[0]            # 32
    action_num = o_ref.shape[0]

    x = x_ref[...]                      # (state_dim, TILE_B), f32
    b1 = b_ref[:hidden, 0:1]            # (32, 1) -> broadcasts over lanes (batch)
    b2 = b_ref[:hidden, 1:2]
    b3 = b_ref[:hidden, 2:3]
    b4 = b_ref[:action_num, 3:4]        # (action_num, 1)

    # Layers 1..3: Linear + Tanh  (batch on lanes: h = W @ x, shape (32, TILE_B)).
    # MXU matmul (f32 accumulate) + EUP tanh; VPU only does the bias add.
    h = jnp.tanh(jnp.dot(w1_ref[...], x, preferred_element_type=jnp.float32) + b1)
    h = jnp.tanh(jnp.dot(w2_ref[...], h, preferred_element_type=jnp.float32) + b2)
    h = jnp.tanh(jnp.dot(w3_ref[...], h, preferred_element_type=jnp.float32) + b3)

    # Layer 4: Linear + Sigmoid (transcendental also goes to the EUP slot).
    z = jnp.dot(w4_ref[...], h, preferred_element_type=jnp.float32) + b4
    o_ref[...] = jax.nn.sigmoid(z).astype(o_ref.dtype)


@functools.partial(jax.jit, static_argnames=("tile_b",))
def critic_forward(state, params, tile_b=1024):
    """state: (B, state_dim) f32.  params: PyTorch-layout weights (out, in), biases (out,)."""
    B, state_dim = state.shape
    action_num = params["w4"].shape[0]

    # Lane-aligned batch tile (multiple of 128).  Large default amortizes the
    # fixed per-grid-step overhead; shrink to a single tile for small batches.
    tile_b = max(128, (min(int(tile_b), 2048) // 128) * 128)
    if B <= tile_b:
        tile_b = ((B + 127) // 128) * 128
    b_pad = pl.cdiv(B, tile_b) * tile_b
    grid = (b_pad // tile_b,)

    # Batch on the lane axis: (B, state_dim) -> (state_dim, B_pad), zero-padded
    # columns (padding flows through the MLP per-column and is sliced off after).
    x_t = jnp.pad(state.astype(jnp.float32).T, ((0, 0), (0, b_pad - B)))

    # Pack all four biases into one resident slab: column j = bias of layer j+1.
    rows = max(HIDDEN, action_num)
    b_slab = jnp.zeros((rows, 4), jnp.float32)
    b_slab = b_slab.at[:HIDDEN, 0].set(params["b1"])
    b_slab = b_slab.at[:HIDDEN, 1].set(params["b2"])
    b_slab = b_slab.at[:HIDDEN, 2].set(params["b3"])
    b_slab = b_slab.at[:action_num, 3].set(params["b4"])

    const = lambda i: (0, 0)   # weights/biases: same block every grid step -> DMA'd once

    out_t = pl.pallas_call(
        _critic_kernel,
        out_shape=jax.ShapeDtypeStruct((action_num, b_pad), jnp.float32),
        grid=grid,
        in_specs=[
            pl.BlockSpec((state_dim, tile_b), lambda i: (0, i)),   # x tile (pipelined)
            pl.BlockSpec((HIDDEN, state_dim), const),              # W1 (out, in), resident
            pl.BlockSpec((HIDDEN, HIDDEN), const),                 # W2
            pl.BlockSpec((HIDDEN, HIDDEN), const),                 # W3
            pl.BlockSpec((action_num, HIDDEN), const),             # W4
            pl.BlockSpec((rows, 4), const),                        # bias slab
        ],
        out_specs=pl.BlockSpec((action_num, tile_b), lambda i: (0, i)),
        compiler_params=pltpu.CompilerParams(
            dimension_semantics=("parallel",)),                    # megacore on v7x
    )(x_t, params["w1"], params["w2"], params["w3"], params["w4"], b_slab)

    # Back to PyTorch layout (B, action_num); output is tiny so this fuses cheaply.
    return out_t[:, :B].T


def init_critic_params(key, state_dim, action_num):
    """PyTorch nn.Linear default init (U[-1/sqrt(fan_in), +1/sqrt(fan_in)]).

    Weights stored in native PyTorch layout (out_features, in_features),
    biases as (out_features,).
    """
    dims = [(state_dim, HIDDEN), (HIDDEN, HIDDEN), (HIDDEN, HIDDEN), (HIDDEN, action_num)]
    params = {}
    for i, (fan_in, fan_out) in enumerate(dims, start=1):
        key, kw, kb = jax.random.split(key, 3)
        bound = 1.0 / float(fan_in) ** 0.5
        params[f"w{i}"] = jax.random.uniform(
            kw, (fan_out, fan_in), jnp.float32, minval=-bound, maxval=bound)
        params[f"b{i}"] = jax.random.uniform(
            kb, (fan_out,), jnp.float32, minval=-bound, maxval=bound)
    return params


def _reference_forward(state, params):
    """Pure-JAX reference (PyTorch orientation: y = x @ W.T + b)."""
    hp = jax.lax.Precision.HIGHEST
    h = jnp.tanh(jnp.dot(state, params["w1"].T, precision=hp) + params["b1"])
    h = jnp.tanh(jnp.dot(h, params["w2"].T, precision=hp) + params["b2"])
    h = jnp.tanh(jnp.dot(h, params["w3"].T, precision=hp) + params["b3"])
    return jax.nn.sigmoid(jnp.dot(h, params["w4"].T, precision=hp) + params["b4"])


if __name__ == "__main__":
    key = jax.random.PRNGKey(0)
    state_dim = 16
    action_num = 4
    batch = 8

    kp, kx = jax.random.split(key)
    params = init_critic_params(kp, state_dim, action_num)
    state = jax.random.normal(kx, (batch, state_dim), jnp.float32)

    out = jax.block_until_ready(critic_forward(state, params))
    ref = _reference_forward(state, params)

    assert out.shape == (batch, action_num)
    # Tolerance covers MXU f32 (multi-pass bf16) vs HIGHEST-precision XLA matmuls
    # and in-kernel vs XLA tanh/sigmoid approximations.
    assert jnp.allclose(out, ref, atol=1e-4, rtol=1e-4), "mismatch vs reference"

    print("KERNEL_OK")
</pallas_src>

<mosaic_0001>
module attributes {stable_mosaic.version = 11 : i64} {
  func.func @_critic_kernel(%arg0: i32, %arg1: memref<16x128xf32, #tpu.memory_space<vmem>>, %arg2: memref<32x16xf32, #tpu.memory_space<vmem>>, %arg3: memref<32x32xf32, #tpu.memory_space<vmem>>, %arg4: memref<32x32xf32, #tpu.memory_space<vmem>>, %arg5: memref<4x32xf32, #tpu.memory_space<vmem>>, %arg6: memref<32x4xf32, #tpu.memory_space<vmem>>, %arg7: memref<4x128xf32, #tpu.memory_space<vmem>>) attributes {dimension_semantics = [#tpu.dimension_semantics<parallel>], iteration_bounds = array<i64: 1>, scalar_prefetch = 0 : i64, scratch_operands = 0 : i64, tpu.core_type = #tpu.core_type<tc>, window_params = [{transform_indices = @transform_0, window_bounds = array<i64: 16, 128>}, {pipeline_mode = #tpu.pipeline_mode<synchronous>, transform_indices = @transform_1, window_bounds = array<i64: 32, 16>}, {pipeline_mode = #tpu.pipeline_mode<synchronous>, transform_indices = @transform_2, window_bounds = array<i64: 32, 32>}, {pipeline_mode = #tpu.pipeline_mode<synchronous>, transform_indices = @transform_3, window_bounds = array<i64: 32, 32>}, {pipeline_mode = #tpu.pipeline_mode<synchronous>, transform_indices = @transform_4, window_bounds = array<i64: 4, 32>}, {pipeline_mode = #tpu.pipeline_mode<synchronous>, transform_indices = @transform_5, window_bounds = array<i64: 32, 4>}, {transform_indices = @transform_6, window_bounds = array<i64: 4, 128>}]} {
    %c0 = arith.constant 0 : index
    %c0_0 = arith.constant 0 : index
    %0 = vector.load %arg1[%c0, %c0_0] : memref<16x128xf32, #tpu.memory_space<vmem>>, vector<16x128xf32>
    %c0_1 = arith.constant 0 : index
    %c0_2 = arith.constant 0 : index
    %1 = vector.load %arg6[%c0_1, %c0_2] : memref<32x4xf32, #tpu.memory_space<vmem>>, vector<32x1xf32>
    %c0_3 = arith.constant 0 : index
    %c1 = arith.constant 1 : index
    %2 = vector.load %arg6[%c0_3, %c1] : memref<32x4xf32, #tpu.memory_space<vmem>>, vector<32x1xf32>
    %c0_4 = arith.constant 0 : index
    %c2 = arith.constant 2 : index
    %3 = vector.load %arg6[%c0_4, %c2] : memref<32x4xf32, #tpu.memory_space<vmem>>, vector<32x1xf32>
    %c0_5 = arith.constant 0 : index
    %c3 = arith.constant 3 : index
    %4 = vector.load %arg6[%c0_5, %c3] : memref<32x4xf32, #tpu.memory_space<vmem>>, vector<4x1xf32>
    %c0_6 = arith.constant 0 : index
    %c0_7 = arith.constant 0 : index
    %5 = vector.load %arg2[%c0_6, %c0_7] : memref<32x16xf32, #tpu.memory_space<vmem>>, vector<32x16xf32>
    %cst = arith.constant dense<0.000000e+00> : vector<32x128xf32>
    %6 = tpu.matmul %5, %0, %cst {dimension_numbers = #tpu.dot_dimension_numbers<[1], [0], [0], [1], [0, 0, 1, 1], [], []>} : vector<32x16xf32>, vector<16x128xf32>, vector<32x128xf32> -> vector<32x128xf32>
    %7 = vector.broadcast %1 : vector<32x1xf32> to vector<32x128xf32>
    %8 = arith.addf %6, %7 : vector<32x128xf32>
    %9 = math.tanh %8 : vector<32x128xf32>
    %c0_8 = arith.constant 0 : index
    %c0_9 = arith.constant 0 : index
    %10 = vector.load %arg3[%c0_8, %c0_9] : memref<32x32xf32, #tpu.memory_space<vmem>>, vector<32x32xf32>
    %cst_10 = arith.constant dense<0.000000e+00> : vector<32x128xf32>
    %11 = tpu.matmul %10, %9, %cst_10 {dimension_numbers = #tpu.dot_dimension_numbers<[1], [0], [0], [1], [0, 0, 1, 1], [], []>} : vector<32x32xf32>, vector<32x128xf32>, vector<32x128xf32> -> vector<32x128xf32>
    %12 = vector.broadcast %2 : vector<32x1xf32> to vector<32x128xf32>
    %13 = arith.addf %11, %12 : vector<32x128xf32>
    %14 = math.tanh %13 : vector<32x128xf32>
    %c0_11 = arith.constant 0 : index
    %c0_12 = arith.constant 0 : index
    %15 = vector.load %arg4[%c0_11, %c0_12] : memref<32x32xf32, #tpu.memory_space<vmem>>, vector<32x32xf32>
    %cst_13 = arith.constant dense<0.000000e+00> : vector<32x128xf32>
    %16 = tpu.matmul %15, %14, %cst_13 {dimension_numbers = #tpu.dot_dimension_numbers<[1], [0], [0], [1], [0, 0, 1, 1], [], []>} : vector<32x32xf32>, vector<32x128xf32>, vector<32x128xf32> -> vector<32x128xf32>
    %17 = vector.broadcast %3 : vector<32x1xf32> to vector<32x128xf32>
    %18 = arith.addf %16, %17 : vector<32x128xf32>
    %19 = math.tanh %18 : vector<32x128xf32>
    %c0_14 = arith.constant 0 : index
    %c0_15 = arith.constant 0 : index
    %20 = vector.load %arg5[%c0_14, %c0_15] : memref<4x32xf32, #tpu.memory_space<vmem>>, vector<4x32xf32>
    %cst_16 = arith.constant dense<0.000000e+00> : vector<4x128xf32>
    %21 = tpu.matmul %20, %19, %cst_16 {dimension_numbers = #tpu.dot_dimension_numbers<[1], [0], [0], [1], [0, 0, 1, 1], [], []>} : vector<4x32xf32>, vector<32x128xf32>, vector<4x128xf32> -> vector<4x128xf32>
    %22 = vector.broadcast %4 : vector<4x1xf32> to vector<4x128xf32>
    %23 = arith.addf %21, %22 : vector<4x128xf32>
    %24 = arith.negf %23 : vector<4x128xf32>
    %25 = math.exp %24 : vector<4x128xf32>
    %cst_17 = arith.constant 1.000000e+00 : f32
    %26 = vector.broadcast %cst_17 : f32 to vector<4x128xf32>
    %27 = arith.addf %26, %25 : vector<4x128xf32>
    %28 = arith.divf %26, %27 : vector<4x128xf32>
    %c0_18 = arith.constant 0 : index
    %c0_19 = arith.constant 0 : index
    %29 = vector.load %arg7[%c0_18, %c0_19] : memref<4x128xf32, #tpu.memory_space<vmem>>, vector<4x128xf32>
    tpu.vector_store %arg7[%c0_18, %c0_19], %28 {strides = array<i32>} : memref<4x128xf32, #tpu.memory_space<vmem>>, vector<4x128xf32>,
    return
  }
  func.func @transform_0(%arg0: i32) -> (i32, i32) {
    %c0_i32 = arith.constant 0 : i32
    %c0_i32_0 = arith.constant 0 : i32
    return %c0_i32, %arg0 : i32, i32
  }
  func.func @transform_1(%arg0: i32) -> (i32, i32) {
    %c0_i32 = arith.constant 0 : i32
    %c0_i32_0 = arith.constant 0 : i32
    %c0_i32_1 = arith.constant 0 : i32
    return %c0_i32, %c0_i32_0 : i32, i32
  }
  func.func @transform_2(%arg0: i32) -> (i32, i32) {
    %c0_i32 = arith.constant 0 : i32
    %c0_i32_0 = arith.constant 0 : i32
    %c0_i32_1 = arith.constant 0 : i32
    return %c0_i32, %c0_i32_0 : i32, i32
  }
  func.func @transform_3(%arg0: i32) -> (i32, i32) {
    %c0_i32 = arith.constant 0 : i32
    %c0_i32_0 = arith.constant 0 : i32
    %c0_i32_1 = arith.constant 0 : i32
    return %c0_i32, %c0_i32_0 : i32, i32
  }
  func.func @transform_4(%arg0: i32) -> (i32, i32) {
    %c0_i32 = arith.constant 0 : i32
    %c0_i32_0 = arith.constant 0 : i32
    %c0_i32_1 = arith.constant 0 : i32
    return %c0_i32, %c0_i32_0 : i32, i32
  }
  func.func @transform_5(%arg0: i32) -> (i32, i32) {
    %c0_i32 = arith.constant 0 : i32
    %c0_i32_0 = arith.constant 0 : i32
    %c0_i32_1 = arith.constant 0 : i32
    return %c0_i32, %c0_i32_0 : i32, i32
  }
  func.func @transform_6(%arg0: i32) -> (i32, i32) {
    %c0_i32 = arith.constant 0 : i32
    %c0_i32_0 = arith.constant 0 : i32
    return %c0_i32, %arg0 : i32, i32
  }
}

</mosaic_0001>

<bundles_post_ra>
// kernel: critic_forward.1
= control target key start
LH: loop header
LB: loop body
LE: loop exit
PB: predicated region body
PF: predicated region fallthrough
CT: control target
= control target key end

     0   :  { %v340_v2 = vmov 0   ;;  %vm54_vm0 = vcmask 130048   ;;  %v341_v16 = vmov 1   ;;  %vm120_vm1 = vcmask 261120   ;;  %s465_s0 = inlined_call_operand.vmem [shape: f32[16,128], index: 0, kind: input, shape index: {}]   ;;  %s466_s1 = inlined_call_operand.vmem [shape: f32[32,16], index: 1, kind: input, shape index: {}]   ;;  %s467_s5 = inlined_call_operand.vmem [shape: f32[32,4], index: 5, kind: input, shape index: {}]   ;;  %s468_s2 = inlined_call_operand.vmem [shape: f32[32,32], index: 2, kind: input, shape index: {}]   ;;  %s469_s3 = inlined_call_operand.vmem [shape: f32[32,32], index: 3, kind: input, shape index: {}]   ;;  %s470_s4 = inlined_call_operand.vmem [shape: f32[4,32], index: 4, kind: input, shape index: {}]   ;;  %s471_s6 = inlined_call_operand.vmem [shape: f32[4,128], index: 6, kind: output, shape index: {}]  }
   0x1   :  { %v24_v0 = vld [vmem:[%s465_s0 + $0x8] sm:$0xff]  ;;  %v23_v1 = vld [vmem:[%s465_s0] sm:$0xff]  ;;  %303 = vset.pattern.permute.xlu1 %v340_v2  ;;  %302 = vset.pattern.permute.xlu0 %v340_v2  ;;  %v397_v5 = vld [vmem:[%s467_s5 + $0x18] sm:$0xff]  ;;  %v342_v36 = vmov 2   ;;  %v343_v56 = vmov 3  }
   0x2   :  { %81 = vmatpush.msra.mxu0 %v24_v0  ;;  %v30_v3 = vld [vmem:[%s466_s1] sm:$0xff]  ;;  %v391_v4 = vld [vmem:[%s467_s5 + $0x8] sm:$0xff]  ;;  %51 = vperm.xlu0 %302, %v397_v5   ;;  %v27_v7 = vld [vmem:[%s467_s5 + $0x10] sm:$0xff] }
   0x3   :  { %41 = vperm.xlu1 %303, %v391_v4   ;;  %v25_v6 = vld [vmem:[%s467_s5] sm:$0xff]  ;;  %v31_v8 = vld [vmem:[%s466_s1 + $0x8] sm:$0xff]  ;;  %v32_v9 = vld [vmem:[%s466_s1 + $0x10] sm:$0xff]  ;;  %304 = vset.pattern.permute.xlu2 %v341_v16 }
   0x4   :  { %82 = vmatpush.msra.mxu0 %v23_v1  ;;  %v33_v10 = vld [vmem:[%s466_s1 + $0x18] sm:$0xff]  ;;  %117 = vperm.xlu2 %304, %v397_v5   ;;  %v100_v27 = vld [vmem:[%s468_s2] sm:$0xff]  ;;  %v101_v29 = vld [vmem:[%s468_s2 + $0x8] sm:$0xff] }
   0x5   :  { %284 = vmatmul.msk.f32.vlgmr.msra.gmra.mxu0 %vm54_vm0, %v30_v3  ;;  %v102_v30 = vld [vmem:[%s468_s2 + $0x10] sm:$0xff]  ;;  %v103_v31 = vld [vmem:[%s468_s2 + $0x18] sm:$0xff]  ;;  %v166_v48 = vld [vmem:[%s469_s3] sm:$0xff] }
   0x6   :  { %v167_v50 = vld [vmem:[%s469_s3 + $0x8] sm:$0xff]  ;;  %v168_v51 = vld [vmem:[%s469_s3 + $0x10] sm:$0xff]  ;;  %v169_v52 = vld [vmem:[%s469_s3 + $0x18] sm:$0xff] }
   0x7   :  { %v29_v55 = vld [vmem:[%s467_s5] sm:$0xf] }
   0xa   :  { %46 = vperm.xlu0 %302, %v27_v7  }
   0xb   :  { %36 = vperm.xlu1 %303, %v25_v6  }
   0xc   :  { %113 = vperm.xlu2 %304, %v27_v7  }
   0xd   :  { %285 = vmatmul.msk.f32.gmra.mxu0 %vm54_vm0, %v31_v8 }
  0x12   :  { %305 = vset.pattern.permute.xlu0 %v341_v16 }
  0x13   :  { %306 = vset.pattern.permute.xlu1 %v341_v16  ;;  %109 = vperm.xlu0 %305, %v391_v4  }
  0x14   :  { %105 = vperm.xlu1 %306, %v25_v6   ;;  %307 = vset.pattern.permute.xlu2 %v342_v36 }
  0x15   :  { %286 = vmatmul.msk.f32.gmra.mxu0 %vm54_vm0, %v32_v9  ;;  %183 = vperm.xlu2 %307, %v397_v5  }
  0x1b   :  { %309 = vset.pattern.permute.xlu0 %v342_v36 }
  0x1c   :  { %308 = vset.pattern.permute.xlu1 %v342_v36  ;;  %171 = vperm.xlu0 %309, %v25_v6   ;;  %v231_v6 = vld [vmem:[%s470_s4] sm:$0xf] }
  0x1d   :  { %287 = vmatmul.msk.f32.gmra.mxu0 %vm54_vm0, %v33_v10  ;;  %179 = vperm.xlu1 %308, %v27_v7  }
  0x1e   :  { %175 = vperm.xlu2 %307, %v391_v4  }
  0x24   :  { %311 = vset.pattern.permute.xlu0 %v343_v56 }
  0x25   :  { %310 = vset.pattern.permute.xlu1 %v343_v56 }
  0x26   :  { %234 = vperm.xlu1 %310, %v29_v55  }
  0x5e   :  { %v118_v34 = vpop.permute.xlu2 %117 }
  0x66   :  { %v114_v37 = vpop.permute.xlu2 %113 }
  0x6f   :  { %v184_v57 = vpop.permute.xlu2 %183 }
  0x74   :  { %v52_v13 = vpop.permute.xlu0 %51 }
  0x75   :  { %v42_v14 = vpop.permute.xlu1 %41 }
  0x78   :  { %v176_v60 = vpop.permute.xlu2 %175 }
  0x7c   :  { %v47_v17 = vpop.permute.xlu0 %46 }
  0x7d   :  { %v37_v21 = vpop.permute.xlu1 %36 }
  0x82   :  { %v84_v11 = vpop.f32.mrf.mxu0 }
  0x83   :  { %v85_v23 = vadd.f32 %v84_v11, %v37_v21 }
  0x85   :  { %v110_v38 = vpop.permute.xlu0 %109 }
  0x86   :  { %v106_v42 = vpop.permute.xlu1 %105 }
  0x8a   :  { %v87_v12 = vpop.f32.mrf.mxu0 }
  0x8b   :  { %v88_v22 = vadd.f32 %v87_v12, %v42_v14 }
  0x8e   :  { %v172_v0 = vpop.permute.xlu0 %171 }
  0x8f   :  { %v180_v59 = vpop.permute.xlu1 %179 }
  0x92   :  { %v90_v15 = vpop.f32.mrf.mxu0 }
  0x93   :  { %v91_v19 = vadd.f32 %v90_v15, %v47_v17 }
  0x98   :  { %v235_v8 = vpop.permute.xlu1 %234 }
  0x9a   :  { %v93_v18 = vpop.f32.mrf.mxu0 }
  0x9b   :  { %v94_v20 = vadd.f32 %v93_v18, %v52_v13 }
  0x9d   :  { %312 = vtanh.f32 %v94_v20 }
  0x9e   :  { %314 = vtanh.f32 %v91_v19 }
  0x9f   :  { %316 = vtanh.f32 %v88_v22 }
  0xa0   :  { %318 = vtanh.f32 %v85_v23 }
  0xa3   :  { %v313_v24 = vpop.eup %312 }
  0xa4   :  { %145 = vmatpush.msra.mxu1 %v313_v24  ;;  %v315_v25 = vpop.eup %314 }
  0xa5   :  { %v317_v26 = vpop.eup %316 }
  0xa6   :  { %146 = vmatpush.msra.mxu1 %v315_v25  ;;  %v319_v28 = vpop.eup %318 }
  0xa8   :  { %147 = vmatpush.msra.mxu1 %v317_v26 }
  0xaa   :  { %148 = vmatpush.msra.mxu1 %v319_v28 }
  0xab   :  { %288 = vmatmul.msk.f32.vlgmr.msra.gmra.mxu1 %vm120_vm1, %v100_v27 }
  0xb3   :  { %289 = vmatmul.msk.f32.gmra.mxu1 %vm120_vm1, %v101_v29 }
  0xbb   :  { %290 = vmatmul.msk.f32.gmra.mxu1 %vm120_vm1, %v102_v30 }
  0xc3   :  { %291 = vmatmul.msk.f32.gmra.mxu1 %vm120_vm1, %v103_v31 }
 0x128   :  { %v150_v32 = vpop.f32.mrf.mxu1 }
 0x129   :  { %v151_v44 = vadd.f32 %v150_v32, %v106_v42 }
 0x130   :  { %v153_v33 = vpop.f32.mrf.mxu1 }
 0x131   :  { %v154_v43 = vadd.f32 %v153_v33, %v110_v38 }
 0x138   :  { %v156_v35 = vpop.f32.mrf.mxu1 }
 0x139   :  { %v157_v40 = vadd.f32 %v156_v35, %v114_v37 }
 0x140   :  { %v159_v39 = vpop.f32.mrf.mxu1 }
 0x141   :  { %v160_v41 = vadd.f32 %v159_v39, %v118_v34 }
 0x143   :  { %320 = vtanh.f32 %v160_v41 }
 0x144   :  { %322 = vtanh.f32 %v157_v40 }
 0x145   :  { %324 = vtanh.f32 %v154_v43 }
 0x146   :  { %326 = vtanh.f32 %v151_v44 }
 0x149   :  { %v321_v45 = vpop.eup %320 }
 0x14a   :  { %210 = vmatpush.msra.mxu2 %v321_v45  ;;  %v323_v46 = vpop.eup %322 }
 0x14b   :  { %v325_v47 = vpop.eup %324 }
 0x14c   :  { %211 = vmatpush.msra.mxu2 %v323_v46  ;;  %v327_v49 = vpop.eup %326 }
 0x14e   :  { %212 = vmatpush.msra.mxu2 %v325_v47 }
 0x150   :  { %213 = vmatpush.msra.mxu2 %v327_v49 }
 0x151   :  { %292 = vmatmul.msk.f32.vlgmr.msra.gmra.mxu2 %vm120_vm1, %v166_v48 }
 0x159   :  { %293 = vmatmul.msk.f32.gmra.mxu2 %vm120_vm1, %v167_v50 }
 0x161   :  { %294 = vmatmul.msk.f32.gmra.mxu2 %vm120_vm1, %v168_v51 }
 0x169   :  { %295 = vmatmul.msk.f32.gmra.mxu2 %vm120_vm1, %v169_v52 }
 0x1d4   :  { %v215_v53 = vpop.f32.mrf.mxu2 }
 0x1d5   :  { %v216_v2 = vadd.f32 %v215_v53, %v172_v0 }
 0x1dc   :  { %v218_v54 = vpop.f32.mrf.mxu2 }
 0x1dd   :  { %v219_v1 = vadd.f32 %v218_v54, %v176_v60 }
 0x1e4   :  { %v221_v58 = vpop.f32.mrf.mxu2 }
 0x1e5   :  { %v222_v62 = vadd.f32 %v221_v58, %v180_v59 }
 0x1ec   :  { %v224_v61 = vpop.f32.mrf.mxu2 }
 0x1ed   :  { %v225_v63 = vadd.f32 %v224_v61, %v184_v57 }
 0x1ef   :  { %328 = vtanh.f32 %v225_v63 }
 0x1f0   :  { %330 = vtanh.f32 %v222_v62 }
 0x1f1   :  { %332 = vtanh.f32 %v219_v1 }
 0x1f2   :  { %334 = vtanh.f32 %v216_v2 }
 0x1f5   :  { %v329_v3 = vpop.eup %328 }
 0x1f6   :  { %252 = vmatpush.msra.mxu3 %v329_v3  ;;  %v331_v4 = vpop.eup %330 }
 0x1f7   :  { %v333_v5 = vpop.eup %332 }
 0x1f8   :  { %253 = vmatpush.msra.mxu3 %v331_v4  ;;  %v335_v7 = vpop.eup %334 }
 0x1fa   :  { %254 = vmatpush.msra.mxu3 %v333_v5 }
 0x1fc   :  { %255 = vmatpush.msra.mxu3 %v335_v7 }
 0x1fd   :  { %296 = vmatmul.msk.f32.vlgmr.msra.gmra.mxu3 %vm120_vm1, %v231_v6 }
 0x280   :  { %v257_v9 = vpop.f32.mrf.mxu3 }
 0x281   :  { %v258_v10 = vadd.f32 %v257_v9, %v235_v8 }
 0x283   :  { %v297_v11 = vmul.f32 -1.442695, %v258_v10 }
 0x285   :  { %336 = vpow2.f32 %v297_v11 }
 0x28b   :  { %v337_v12 = vpop.eup %336 }
 0x28c   :  { %v263_v13 = vadd.f32 1.0, %v337_v12 }
 0x28e   :  { %338 = vrcp.f32 %v263_v13  ;;  %v275_v17 = vand.u32 2147483648, %v263_v13  ;;  %v273_v19 = vand.u32 2147483647, %v263_v13  ;;  %vm269_vm3 = vweird.f32 %v263_v13 }
 0x290   :  { %v276_v21 = vor.u32 1.1754944e-38, %v275_v17  ;;  %vm274_vm5 = vcmp.eq.f32.partialorder %v273_v19, 8.507059e+37 }
 0x294   :  { %v339_v14 = vpop.eup %338 }
 0x295   :  { %v265_v15 = vmul.f32 %v339_v14, %v263_v13  ;;  %vm270_vm2 = vweird.f32 %v339_v14 }
 0x296   :  { %vm271_vm4 = vmor %vm269_vm3, %vm270_vm2 }
 0x297   :  { %v266_v16 = vsub.f32 1.0, %v265_v15 }
 0x299   :  { %v267_v18 = vmul.f32 %v339_v14, %v266_v16 }
 0x29b   :  { %v268_v20 = vadd.f32 %v339_v14, %v267_v18 }
 0x29d   :  { %v272_v22 = vsel %vm271_vm4, %v339_v14, %v268_v20 }
 0x29e   :  { %v277_v23 = vsel %vm274_vm5, %v276_v21, %v272_v22 }
 0x29f   :  { %279 = vst [vmem:[%s471_s6] sm:$0xf] %v277_v23 }

</bundles_post_ra>
